<compile_context>
chip_gen: v7x
topology: tpu7x:2x2x1
jax: 0.10.0
libtpu: 0.0.40
codegen_flags: <defaults>
</compile_context>

<pallas_src>
import jax
import jax.numpy as jnp
from jax.experimental import pallas as pl
from jax.experimental.pallas import tpu as pltpu


# ---------------------------------------------------------------------------
# Exact GELU (erf-based), built only from ops guaranteed to lower in Mosaic.
# Abramowitz & Stegun 7.1.26: |erf_approx - erf| <= 1.5e-7 (below f32 eps of the MLP).
# ---------------------------------------------------------------------------
_ERF_P = 0.3275911
_ERF_A1 = 0.254829592
_ERF_A2 = -0.284496736
_ERF_A3 = 1.421413741
_ERF_A4 = -1.453152027
_ERF_A5 = 1.061405429


def _erf(z):
    a = jnp.abs(z)
    t = 1.0 / (1.0 + _ERF_P * a)
    poly = t * (_ERF_A1 + t * (_ERF_A2 + t * (_ERF_A3 + t * (_ERF_A4 + t * _ERF_A5))))
    e = 1.0 - poly * jnp.exp(-a * a)
    return jnp.where(z < 0.0, -e, e)


def _gelu_exact(x):
    return 0.5 * x * (1.0 + _erf(x * 0.7071067811865476))


# ---------------------------------------------------------------------------
# Kernel body: one row-tile of  gelu(gelu(x @ W1 + b1) @ W2 + b2).
# BN is pre-folded into W1/b1; row-packing (if any) is expressed through
# block-diagonal weights, so the body is always two plain MXU matmuls.
# ---------------------------------------------------------------------------
def _embedding_kernel(x_ref, w1_ref, b1_ref, w2_ref, b2_ref, o_ref):
    x = x_ref[...]
    h = jnp.dot(x, w1_ref[...], preferred_element_type=jnp.float32,
                precision=jax.lax.Precision.HIGHEST) + b1_ref[...]
    h = _gelu_exact(h)
    h = jnp.dot(h, w2_ref[...], preferred_element_type=jnp.float32,
                precision=jax.lax.Precision.HIGHEST) + b2_ref[...]
    h = _gelu_exact(h)
    o_ref[...] = h.astype(o_ref.dtype)


def embedding_forward(x, params, *, tile_m=2048):
    """x: (B, S, D_in) float32.  Returns (B, S, H2) float32.

    tile_m = logical rows per grid step (v5e/v6e sweet spot ~1024-2048, v7x 2048-4096);
    it is clamped to the problem size below.
    """
    B, S, D_in = x.shape
    bn_scale, bn_shift, w1, b1, w2, b2 = params          # bn_* (1,D_in); b* (1,H)
    H1 = w1.shape[1]
    H2 = w2.shape[1]
    M = B * S

    # ---- fold eval-mode BatchNorm into the first Linear (once, outside the kernel) ----
    w1f = bn_scale.reshape(D_in, 1) * w1                 # (D_in, H1)
    b1f = (b1 + bn_shift @ w1).reshape(1, H1)            # (1, H1)
    b2r = b2.reshape(1, H2)

    # ---- row packing factor: make the output store lane-dense with zero padded bytes --
    if H2 < 128 and 128 % H2 == 0 and M % (128 // H2) == 0:
        p = 128 // H2
    else:
        p = 1                                            # fallback: masked store if H2<128

    if p > 1:
        eye = jnp.eye(p, dtype=w1f.dtype)
        w1k = jnp.kron(eye, w1f)                         # (p*D_in, p*H1) block-diagonal
        b1k = jnp.tile(b1f, (1, p))                      # (1, p*H1)
        w2k = jnp.kron(eye, w2)                          # (p*H1, p*H2) block-diagonal
        b2k = jnp.tile(b2r, (1, p))                      # (1, p*H2)
    else:
        w1k, b1k, w2k, b2k = w1f, b1f, w2, b2r

    Din_p, H1_p, H2_p = D_in * p, H1 * p, H2 * p
    Mp = M // p

    # Packed 2-D view of x: contiguous row-major reshape => no data movement / no pad.
    x2d = x.reshape(Mp, Din_p)

    # ---- tile the (packed) row dimension; clamp to the problem, keep sublane-aligned --
    tile_rows = max(1, min(tile_m // p, Mp))
    tile_rows = max(8, ((tile_rows + 7) // 8) * 8)
    grid = (pl.cdiv(Mp, tile_rows),)

    cost = pl.CostEstimate(
        flops=2 * M * (D_in * H1 + H1 * H2),
        transcendentals=M * (H1 + H2),
        bytes_accessed=4 * (M * D_in + M * H2
                            + Din_p * H1_p + H1_p * H2_p + H1_p + H2_p),
    )

    out2d = pl.pallas_call(
        _embedding_kernel,
        out_shape=jax.ShapeDtypeStruct((Mp, H2_p), jnp.float32),
        grid_spec=pltpu.PrefetchScalarGridSpec(
            num_scalar_prefetch=0,
            grid=grid,
            in_specs=[
                pl.BlockSpec((tile_rows, Din_p), lambda i: (i, 0)),  # x rows (packed)
                pl.BlockSpec((Din_p, H1_p), lambda i: (0, 0)),       # W1 (BN-folded)
                pl.BlockSpec((1, H1_p), lambda i: (0, 0)),           # b1 (BN-folded)
                pl.BlockSpec((H1_p, H2_p), lambda i: (0, 0)),        # W2
                pl.BlockSpec((1, H2_p), lambda i: (0, 0)),           # b2
            ],
            out_specs=pl.BlockSpec((tile_rows, H2_p), lambda i: (i, 0)),
        ),
        compiler_params=pltpu.CompilerParams(
            dimension_semantics=("parallel",)),
        cost_estimate=cost,
    )(x2d, w1k, b1k, w2k, b2k)

    # Un-pack: contiguous row-major reshape back to logical rows => no data movement.
    return out2d.reshape(B, S, H2)


# ---------------------------------------------------------------------------
# Parameter construction and pure-JAX reference (unfused, validates BN fold + packing).
# ---------------------------------------------------------------------------
def make_params(key, input_dim, embed_dims, eps=1e-5):
    assert len(embed_dims) == 2, "this script instantiates embed_dims=[H1, H2]"
    H1, H2 = embed_dims
    ks = jax.random.split(key, 8)

    # BatchNorm1d(input_dim) — eval-mode parameters.
    gamma = jax.random.uniform(ks[0], (input_dim,), jnp.float32, 0.5, 1.5)
    beta = jax.random.uniform(ks[1], (input_dim,), jnp.float32, -0.5, 0.5)
    running_mean = jax.random.uniform(ks[2], (input_dim,), jnp.float32, -1.0, 1.0)
    running_var = jax.random.uniform(ks[3], (input_dim,), jnp.float32, 0.5, 2.0)
    bn_scale = gamma / jnp.sqrt(running_var + eps)
    bn_shift = beta - running_mean * bn_scale

    # Linear layers (weights stored as (in, out) = PyTorch weight.T).
    w1 = jax.random.uniform(ks[4], (input_dim, H1), jnp.float32, -0.3, 0.3)
    b1 = jax.random.uniform(ks[5], (H1,), jnp.float32, -0.1, 0.1)
    w2 = jax.random.uniform(ks[6], (H1, H2), jnp.float32, -0.3, 0.3)
    b2 = jax.random.uniform(ks[7], (H2,), jnp.float32, -0.1, 0.1)

    return (bn_scale.reshape(1, input_dim), bn_shift.reshape(1, input_dim),
            w1, b1.reshape(1, H1), w2, b2.reshape(1, H2))


def reference_forward(x, params):
    bn_scale, bn_shift, w1, b1, w2, b2 = params
    hp = jax.lax.Precision.HIGHEST
    h = x * bn_scale[0] + bn_shift[0]
    h = jax.nn.gelu(jnp.dot(h, w1, precision=hp) + b1[0], approximate=False)
    h = jax.nn.gelu(jnp.dot(h, w2, precision=hp) + b2[0], approximate=False)
    return h


if __name__ == "__main__":
    B, S, D_IN = 2, 8, 16
    EMBED_DIMS = [32, 64]

    key = jax.random.PRNGKey(0)
    kx, kp = jax.random.split(key)

    x = jax.random.normal(kx, (B, S, D_IN), dtype=jnp.float32)
    params = make_params(kp, D_IN, EMBED_DIMS)

    out = embedding_forward(x, params)
    out = jax.block_until_ready(out)

    ref = reference_forward(x, params)
    assert out.shape == (B, S, EMBED_DIMS[-1])
    assert jnp.allclose(out, ref, atol=1e-4, rtol=1e-4), "mismatch vs pure-JAX reference"

    print("KERNEL_OK")
</pallas_src>

<mosaic_0001>
module attributes {stable_mosaic.version = 11 : i64} {
  func.func @_embedding_kernel(%arg0: i32, %arg1: memref<8x32xf32, #tpu.memory_space<vmem>>, %arg2: memref<32x64xf32, #tpu.memory_space<vmem>>, %arg3: memref<1x64xf32, #tpu.memory_space<vmem>>, %arg4: memref<64x128xf32, #tpu.memory_space<vmem>>, %arg5: memref<1x128xf32, #tpu.memory_space<vmem>>, %arg6: memref<8x128xf32, #tpu.memory_space<vmem>>) attributes {dimension_semantics = [#tpu.dimension_semantics<parallel>], iteration_bounds = array<i64: 1>, scalar_prefetch = 0 : i64, scratch_operands = 0 : i64, tpu.core_type = #tpu.core_type<tc>, window_params = [{transform_indices = @transform_0, window_bounds = array<i64: 8, 32>}, {pipeline_mode = #tpu.pipeline_mode<synchronous>, transform_indices = @transform_1, window_bounds = array<i64: 32, 64>}, {pipeline_mode = #tpu.pipeline_mode<synchronous>, transform_indices = @transform_2, window_bounds = array<i64: 1, 64>}, {pipeline_mode = #tpu.pipeline_mode<synchronous>, transform_indices = @transform_3, window_bounds = array<i64: 64, 128>}, {pipeline_mode = #tpu.pipeline_mode<synchronous>, transform_indices = @transform_4, window_bounds = array<i64: 1, 128>}, {transform_indices = @transform_5, window_bounds = array<i64: 8, 128>}]} {
    %c0 = arith.constant 0 : index
    %c0_0 = arith.constant 0 : index
    %0 = vector.load %arg1[%c0, %c0_0] : memref<8x32xf32, #tpu.memory_space<vmem>>, vector<8x32xf32>
    %c0_1 = arith.constant 0 : index
    %c0_2 = arith.constant 0 : index
    %1 = vector.load %arg2[%c0_1, %c0_2] : memref<32x64xf32, #tpu.memory_space<vmem>>, vector<32x64xf32>
    %cst = arith.constant dense<0.000000e+00> : vector<8x64xf32>
    %2 = tpu.matmul %0, %1, %cst {dimension_numbers = #tpu.dot_dimension_numbers<[1], [0], [0], [1], [0, 0, 1, 1], [], []>, precision = #tpu.contract_precision<fp32>} : vector<8x32xf32>, vector<32x64xf32>, vector<8x64xf32> -> vector<8x64xf32>
    %c0_3 = arith.constant 0 : index
    %c0_4 = arith.constant 0 : index
    %3 = vector.load %arg3[%c0_3, %c0_4] : memref<1x64xf32, #tpu.memory_space<vmem>>, vector<1x64xf32>
    %4 = vector.broadcast %3 : vector<1x64xf32> to vector<8x64xf32>
    %5 = arith.addf %2, %4 : vector<8x64xf32>
    %cst_5 = arith.constant 5.000000e-01 : f32
    %6 = vector.broadcast %cst_5 : f32 to vector<8x64xf32>
    %7 = arith.mulf %6, %5 : vector<8x64xf32>
    %cst_6 = arith.constant 0.707106769 : f32
    %8 = vector.broadcast %cst_6 : f32 to vector<8x64xf32>
    %9 = arith.mulf %5, %8 : vector<8x64xf32>
    %10 = math.absf %9 : vector<8x64xf32>
    %cst_7 = arith.constant 0.327591091 : f32
    %11 = vector.broadcast %cst_7 : f32 to vector<8x64xf32>
    %12 = arith.mulf %11, %10 : vector<8x64xf32>
    %cst_8 = arith.constant 1.000000e+00 : f32
    %13 = vector.broadcast %cst_8 : f32 to vector<8x64xf32>
    %14 = arith.addf %13, %12 : vector<8x64xf32>
    %cst_9 = arith.constant 1.000000e+00 : f32
    %15 = vector.broadcast %cst_9 : f32 to vector<8x64xf32>
    %16 = arith.divf %15, %14 : vector<8x64xf32>
    %cst_10 = arith.constant 1.06140542 : f32
    %17 = vector.broadcast %cst_10 : f32 to vector<8x64xf32>
    %18 = arith.mulf %16, %17 : vector<8x64xf32>
    %cst_11 = arith.constant -1.45315206 : f32
    %19 = vector.broadcast %cst_11 : f32 to vector<8x64xf32>
    %20 = arith.addf %19, %18 : vector<8x64xf32>
    %21 = arith.mulf %16, %20 : vector<8x64xf32>
    %cst_12 = arith.constant 1.42141378 : f32
    %22 = vector.broadcast %cst_12 : f32 to vector<8x64xf32>
    %23 = arith.addf %22, %21 : vector<8x64xf32>
    %24 = arith.mulf %16, %23 : vector<8x64xf32>
    %cst_13 = arith.constant -0.284496725 : f32
    %25 = vector.broadcast %cst_13 : f32 to vector<8x64xf32>
    %26 = arith.addf %25, %24 : vector<8x64xf32>
    %27 = arith.mulf %16, %26 : vector<8x64xf32>
    %cst_14 = arith.constant 0.254829586 : f32
    %28 = vector.broadcast %cst_14 : f32 to vector<8x64xf32>
    %29 = arith.addf %28, %27 : vector<8x64xf32>
    %30 = arith.mulf %16, %29 : vector<8x64xf32>
    %cst_15 = arith.constant 0.000000e+00 : f32
    %31 = vector.broadcast %cst_15 : f32 to vector<8x64xf32>
    %32 = arith.subf %31, %10 : vector<8x64xf32>
    %33 = arith.mulf %32, %10 : vector<8x64xf32>
    %34 = math.exp %33 : vector<8x64xf32>
    %35 = arith.mulf %30, %34 : vector<8x64xf32>
    %cst_16 = arith.constant 1.000000e+00 : f32
    %36 = vector.broadcast %cst_16 : f32 to vector<8x64xf32>
    %37 = arith.subf %36, %35 : vector<8x64xf32>
    %cst_17 = arith.constant 0.000000e+00 : f32
    %38 = vector.broadcast %cst_17 : f32 to vector<8x64xf32>
    %39 = arith.cmpf olt, %9, %38 : vector<8x64xf32>
    %cst_18 = arith.constant 0.000000e+00 : f32
    %40 = vector.broadcast %cst_18 : f32 to vector<8x64xf32>
    %41 = arith.subf %40, %37 : vector<8x64xf32>
    %42 = arith.select %39, %41, %37 : vector<8x64xi1>, vector<8x64xf32>
    %cst_19 = arith.constant 1.000000e+00 : f32
    %43 = vector.broadcast %cst_19 : f32 to vector<8x64xf32>
    %44 = arith.addf %43, %42 : vector<8x64xf32>
    %45 = arith.mulf %7, %44 : vector<8x64xf32>
    %c0_20 = arith.constant 0 : index
    %c0_21 = arith.constant 0 : index
    %46 = vector.load %arg4[%c0_20, %c0_21] : memref<64x128xf32, #tpu.memory_space<vmem>>, vector<64x128xf32>
    %cst_22 = arith.constant dense<0.000000e+00> : vector<8x128xf32>
    %47 = tpu.matmul %45, %46, %cst_22 {dimension_numbers = #tpu.dot_dimension_numbers<[1], [0], [0], [1], [0, 0, 1, 1], [], []>, precision = #tpu.contract_precision<fp32>} : vector<8x64xf32>, vector<64x128xf32>, vector<8x128xf32> -> vector<8x128xf32>
    %c0_23 = arith.constant 0 : index
    %c0_24 = arith.constant 0 : index
    %48 = vector.load %arg5[%c0_23, %c0_24] : memref<1x128xf32, #tpu.memory_space<vmem>>, vector<1x128xf32>
    %49 = vector.broadcast %48 : vector<1x128xf32> to vector<8x128xf32>
    %50 = arith.addf %47, %49 : vector<8x128xf32>
    %cst_25 = arith.constant 5.000000e-01 : f32
    %51 = vector.broadcast %cst_25 : f32 to vector<8x128xf32>
    %52 = arith.mulf %51, %50 : vector<8x128xf32>
    %cst_26 = arith.constant 0.707106769 : f32
    %53 = vector.broadcast %cst_26 : f32 to vector<8x128xf32>
    %54 = arith.mulf %50, %53 : vector<8x128xf32>
    %55 = math.absf %54 : vector<8x128xf32>
    %cst_27 = arith.constant 0.327591091 : f32
    %56 = vector.broadcast %cst_27 : f32 to vector<8x128xf32>
    %57 = arith.mulf %56, %55 : vector<8x128xf32>
    %cst_28 = arith.constant 1.000000e+00 : f32
    %58 = vector.broadcast %cst_28 : f32 to vector<8x128xf32>
    %59 = arith.addf %58, %57 : vector<8x128xf32>
    %cst_29 = arith.constant 1.000000e+00 : f32
    %60 = vector.broadcast %cst_29 : f32 to vector<8x128xf32>
    %61 = arith.divf %60, %59 : vector<8x128xf32>
    %cst_30 = arith.constant 1.06140542 : f32
    %62 = vector.broadcast %cst_30 : f32 to vector<8x128xf32>
    %63 = arith.mulf %61, %62 : vector<8x128xf32>
    %cst_31 = arith.constant -1.45315206 : f32
    %64 = vector.broadcast %cst_31 : f32 to vector<8x128xf32>
    %65 = arith.addf %64, %63 : vector<8x128xf32>
    %66 = arith.mulf %61, %65 : vector<8x128xf32>
    %cst_32 = arith.constant 1.42141378 : f32
    %67 = vector.broadcast %cst_32 : f32 to vector<8x128xf32>
    %68 = arith.addf %67, %66 : vector<8x128xf32>
    %69 = arith.mulf %61, %68 : vector<8x128xf32>
    %cst_33 = arith.constant -0.284496725 : f32
    %70 = vector.broadcast %cst_33 : f32 to vector<8x128xf32>
    %71 = arith.addf %70, %69 : vector<8x128xf32>
    %72 = arith.mulf %61, %71 : vector<8x128xf32>
    %cst_34 = arith.constant 0.254829586 : f32
    %73 = vector.broadcast %cst_34 : f32 to vector<8x128xf32>
    %74 = arith.addf %73, %72 : vector<8x128xf32>
    %75 = arith.mulf %61, %74 : vector<8x128xf32>
    %cst_35 = arith.constant 0.000000e+00 : f32
    %76 = vector.broadcast %cst_35 : f32 to vector<8x128xf32>
    %77 = arith.subf %76, %55 : vector<8x128xf32>
    %78 = arith.mulf %77, %55 : vector<8x128xf32>
    %79 = math.exp %78 : vector<8x128xf32>
    %80 = arith.mulf %75, %79 : vector<8x128xf32>
    %cst_36 = arith.constant 1.000000e+00 : f32
    %81 = vector.broadcast %cst_36 : f32 to vector<8x128xf32>
    %82 = arith.subf %81, %80 : vector<8x128xf32>
    %cst_37 = arith.constant 0.000000e+00 : f32
    %83 = vector.broadcast %cst_37 : f32 to vector<8x128xf32>
    %84 = arith.cmpf olt, %54, %83 : vector<8x128xf32>
    %cst_38 = arith.constant 0.000000e+00 : f32
    %85 = vector.broadcast %cst_38 : f32 to vector<8x128xf32>
    %86 = arith.subf %85, %82 : vector<8x128xf32>
    %87 = arith.select %84, %86, %82 : vector<8x128xi1>, vector<8x128xf32>
    %cst_39 = arith.constant 1.000000e+00 : f32
    %88 = vector.broadcast %cst_39 : f32 to vector<8x128xf32>
    %89 = arith.addf %88, %87 : vector<8x128xf32>
    %90 = arith.mulf %52, %89 : vector<8x128xf32>
    %c0_40 = arith.constant 0 : index
    %c0_41 = arith.constant 0 : index
    %91 = vector.load %arg6[%c0_40, %c0_41] : memref<8x128xf32, #tpu.memory_space<vmem>>, vector<8x128xf32>
    tpu.vector_store %arg6[%c0_40, %c0_41], %90 {strides = array<i32>} : memref<8x128xf32, #tpu.memory_space<vmem>>, vector<8x128xf32>,
    return
  }
  func.func @transform_0(%arg0: i32) -> (i32, i32) {
    %c0_i32 = arith.constant 0 : i32
    %c0_i32_0 = arith.constant 0 : i32
    return %arg0, %c0_i32 : i32, i32
  }
  func.func @transform_1(%arg0: i32) -> (i32, i32) {
    %c0_i32 = arith.constant 0 : i32
    %c0_i32_0 = arith.constant 0 : i32
    %c0_i32_1 = arith.constant 0 : i32
    return %c0_i32, %c0_i32_0 : i32, i32
  }
  func.func @transform_2(%arg0: i32) -> (i32, i32) {
    %c0_i32 = arith.constant 0 : i32
    %c0_i32_0 = arith.constant 0 : i32
    %c0_i32_1 = arith.constant 0 : i32
    return %c0_i32, %c0_i32_0 : i32, i32
  }
  func.func @transform_3(%arg0: i32) -> (i32, i32) {
    %c0_i32 = arith.constant 0 : i32
    %c0_i32_0 = arith.constant 0 : i32
    %c0_i32_1 = arith.constant 0 : i32
    return %c0_i32, %c0_i32_0 : i32, i32
  }
  func.func @transform_4(%arg0: i32) -> (i32, i32) {
    %c0_i32 = arith.constant 0 : i32
    %c0_i32_0 = arith.constant 0 : i32
    %c0_i32_1 = arith.constant 0 : i32
    return %c0_i32, %c0_i32_0 : i32, i32
  }
  func.func @transform_5(%arg0: i32) -> (i32, i32) {
    %c0_i32 = arith.constant 0 : i32
    %c0_i32_0 = arith.constant 0 : i32
    return %arg0, %c0_i32 : i32, i32
  }
}

</mosaic_0001>

<bundles_post_ra>
// kernel: tpu_custom_call.1
= control target key start
LH: loop header
LB: loop body
LE: loop exit
PB: predicated region body
PF: predicated region fallthrough
CT: control target
= control target key end

     0   :  { %10 = vsyncpa [#allocation3], 0  ;;  %s1933_s0 = inlined_call_operand.hbm [shape: f32[8,32], index: 0, kind: input, shape index: {}]   ;;  %s1934_s1 = inlined_call_operand.hbm [shape: f32[32,64], index: 1, kind: input, shape index: {}]   ;;  %s1935_s2 = inlined_call_operand.vmem [shape: f32[1,64], index: 2, kind: input, shape index: {}]   ;;  %s1936_s3 = inlined_call_operand.hbm [shape: f32[64,128], index: 3, kind: input, shape index: {}]   ;;  %s1937_s4 = inlined_call_operand.vmem [shape: f32[1,128], index: 4, kind: input, shape index: {}]   ;;  %s1938_s5 = inlined_call_operand.hbm [shape: f32[8,128], index: 5, kind: output, shape index: {}]  }
   0x1   :  { %11 = vsyncpa [#allocation6], 0 }
   0x2   :  { %12 = vsyncpa [#allocation4], 0  ;;  %s1694_s18 = smov [#allocation5]   ;;  %s1600_s22 = scalar_lea.hbm %s1934_s1, 512 }
   0x3   :  { %s28_s19 = sshll.u32 %s1694_s18, 4  ;;  %p1601_p0 = scmp.ne.s32.totalorder %s1934_s1, %s1600_s22  ;;  %s29_s19 = int_to_ptr.vmem [resolvable:$true] %s28_s19 }
   0x4   :  { %p1604_p1 = scmp.lt.u32.totalorder %s1600_s22, %s1934_s1 }
   0x6   :  { %p1606_p2 = pnand %p1604_p1, %p1601_p0 }
   0x8   :  { %1609 = shalt.err (!%p1606_p2)
}
   0x9   :  { %s1610_s27 = scalar_lea.vmem %s29_s19, 512  ;;  %p1615_p4 = scmp.lt.s32.totalorder %s29_s19, %s29_s19 }
   0xa   :  { %p1611_p3 = scmp.ne.s32.totalorder %s29_s19, %s1610_s27  ;;  %p1616_p5 = scmp.lt.s32.totalorder %s1610_s27, %s1610_s27 }
   0xc   :  { %p1617_p6 = por %p1616_p5, %p1615_p4 }
   0xe   :  { %p1618_p7 = pnand %p1617_p6, %p1611_p3 }
  0x10   :  { %1621 = shalt.err (!%p1618_p7)
}
  0x11   :  { %s1695_s28 = smov 128   ;;  %s1696_s29 = smov 8  }
  0x12   :  { %34 = dma.hbm_to_vmem [thread:$0]  %s1934_s1, 512, %s29_s19, [#allocation6], %s1695_s28, %s1695_s28, %s1696_s29  }
  0x13   :  { %s1697_s7 = smov [#allocation2]   ;;  %s1698_s9 = smov [#allocation7]  }
  0x14   :  { %s19_s8 = sshll.u32 %s1697_s7, 4  ;;  %s42_s10 = sshll.u32 %s1698_s9, 4  ;;  %s20_s8 = int_to_ptr.vmem [resolvable:$true] %s19_s8  ;;  %s43_s10 = int_to_ptr.vmem [resolvable:$true] %s42_s10 }
  0x15   :  { %s1622_s13 = scalar_lea.hbm %s1933_s0, 128 }
  0x16   :  { %p1623_p8 = scmp.ne.s32.totalorder %s1933_s0, %s1622_s13  ;;  %p1626_p9 = scmp.lt.u32.totalorder %s1622_s13, %s1933_s0 }
  0x18   :  { %p1628_p10 = pnand %p1626_p9, %p1623_p8 }
  0x1a   :  { %1631 = shalt.err (!%p1628_p10)
}
  0x1b   :  { %s1632_s1 = scalar_lea.vmem %s20_s8, 128  ;;  %p1637_p12 = scmp.lt.s32.totalorder %s20_s8, %s20_s8 }
  0x1c   :  { %p1633_p11 = scmp.ne.s32.totalorder %s20_s8, %s1632_s1  ;;  %p1638_p13 = scmp.lt.s32.totalorder %s1632_s1, %s1632_s1 }
  0x1e   :  { %p1639_p0 = por %p1638_p13, %p1637_p12 }
  0x20   :  { %p1640_p1 = pnand %p1639_p0, %p1633_p11 }
  0x22   :  { %1643 = shalt.err (!%p1640_p1)
}
  0x23   :  { %22 = dma.hbm_to_vmem [thread:$0]  %s1933_s0, 128, %s20_s8, [#allocation3]  }
  0x24   :  { %s1644_s22 = scalar_lea.hbm %s1936_s3, 1024 }
  0x25   :  { %p1645_p2 = scmp.ne.s32.totalorder %s1936_s3, %s1644_s22  ;;  %p1648_p3 = scmp.lt.u32.totalorder %s1644_s22, %s1936_s3 }
  0x27   :  { %p1650_p4 = pnand %p1648_p3, %p1645_p2 }
  0x29   :  { %1653 = shalt.err (!%p1650_p4)
}
  0x2a   :  { %s1654_s27 = scalar_lea.vmem %s43_s10, 1024  ;;  %p1659_p6 = scmp.lt.s32.totalorder %s43_s10, %s43_s10 }
  0x2b   :  { %p1655_p5 = scmp.ne.s32.totalorder %s43_s10, %s1654_s27  ;;  %p1660_p7 = scmp.lt.s32.totalorder %s1654_s27, %s1654_s27 }
  0x2d   :  { %p1661_p8 = por %p1660_p7, %p1659_p6 }
  0x2f   :  { %p1662_p9 = pnand %p1661_p8, %p1655_p5 }
  0x31   :  { %1665 = shalt.err (!%p1662_p9)
}
  0x32   :  { %48 = dma.hbm_to_vmem [thread:$0]  %s1936_s3, 1024, %s43_s10, [#allocation6], %s1695_s28, %s1695_s28, %s1696_s29  }
  0x33   :  { %1688 = dma.done.wait [#allocation3], 128  }
  0x34   :  { %1689 = vsyncadd [#allocation3], 4294967168 }
  0x35   :  { %1690 = dma.done.wait [#allocation6], 1536  }
  0x36   :  { %1691 = vsyncadd [#allocation6], 4294965760  ;;  %v1699_v0 = vmov 0.0|0.0   ;;  %vm1700_vm0 = vmmov 0   ;;  %v1701_v1 = vmov 0.0   ;;  %vm72_vm1 = vcmask 261120  }
  0x37   :  { %1454 = vmatprep.subr.bf16.mxu0 %v1699_v0  ;;  %1282 = vmatprep.mubr.msk.f32.mxu0 %vm1700_vm0, %v1701_v1  ;;  %v61_v2 = vld [vmem:[#allocation5] sm:$0xff]  ;;  %v62_v3 = vld [vmem:[#allocation5 + $0x8] sm:$0xff]  ;;  %v63_v4 = vld [vmem:[#allocation5 + $0x10] sm:$0xff]  ;;  %vm603_vm3 = vcmask 523264  }
  0x38   :  { %1502 = vmatprep.subr.bf16.mxu1 %v1699_v0  ;;  %1375 = vmatprep.mubr.msk.f32.mxu1 %vm1700_vm0, %v1701_v1  ;;  %v77_v5 = vand.u32 4294901760, %v61_v2  ;;  %v80_v6 = vand.u32 4294901760, %v62_v3  ;;  %v64_v7 = vld [vmem:[#allocation5 + $0x18] sm:$0xff]  ;;  %v83_v8 = vand.u32 4294901760, %v63_v4  ;;  %v588_v41 = vld [vmem:[#allocation7] sm:$0xff]  ;;  %v589_v42 = vld [vmem:[#allocation7 + $0x8] sm:$0xff] }
  0x39   :  { %v60_v9 = vld [vmem:[#allocation2] sm:$0xff]  ;;  %v86_v10 = vand.u32 4294901760, %v64_v7  ;;  %v608_v43 = vand.u32 4294901760, %v588_v41  ;;  %v611_v44 = vand.u32 4294901760, %v589_v42  ;;  %v590_v47 = vld [vmem:[#allocation7 + $0x10] sm:$0xff]  ;;  %v592_v57 = vld [vmem:[#allocation7 + $0x20] sm:$0xff] }
  0x3a   :  { %v74_v11 = vsel %vm72_vm1, %v60_v9, 0  ;;  %v1455_v12 = vpack.c.bf16 %v80_v6, %v77_v5  ;;  %v157_v13 = vsub.f32 %v61_v2, %v77_v5  ;;  %v164_v14 = vsub.f32 %v62_v3, %v80_v6  ;;  %v591_v48 = vld [vmem:[#allocation7 + $0x18] sm:$0xff]  ;;  %v593_v58 = vld [vmem:[#allocation7 + $0x28] sm:$0xff] }
  0x3b   :  { %v171_v15 = vsub.f32 %v63_v4, %v83_v8  ;;  %v178_v16 = vsub.f32 %v64_v7, %v86_v10  ;;  %v145_v17 = vand.u32 4294901760, %v74_v11  ;;  %v1458_v18 = vpack.c.bf16 %v86_v10, %v83_v8  ;;  %v594_v8 = vld [vmem:[#allocation7 + $0x30] sm:$0xff]  ;;  %v595_v9 = vld [vmem:[#allocation7 + $0x38] sm:$0xff] }
  0x3c   :  { %1456 = vmatpush3.bf16.msra.mxu0 %v1455_v12  ;;  %v158_v19 = vand.u32 4294901760, %v157_v13  ;;  %v165_v20 = vand.u32 4294901760, %v164_v14  ;;  %v1467_v37 = vpack.c.bf16 %v164_v14, %v157_v13  ;;  %v1805_v45 = vsub.f32 %v588_v41, %v608_v43 }
  0x3d   :  { %v172_v21 = vand.u32 4294901760, %v171_v15  ;;  %1457 = vmatprep.subr.bf16.mxu0 %v1699_v0  ;;  %v146_v22 = vsub.f32 %v74_v11, %v145_v17  ;;  %v179_v23 = vand.u32 4294901760, %v178_v16  ;;  %v1470_v38 = vpack.c.bf16 %v178_v16, %v171_v15 }
  0x3e   :  { %v159_v24 = vsub.f32 %v157_v13, %v158_v19  ;;  %v166_v25 = vsub.f32 %v164_v14, %v165_v20  ;;  %v1479_v39 = vpack.c.bf16 %v165_v20, %v158_v19  ;;  %v1807_v46 = vsub.f32 %v589_v42, %v611_v44 }
  0x3f   :  { %v173_v26 = vsub.f32 %v171_v15, %v172_v21  ;;  %v147_v27 = vand.u32 4294901760, %v146_v22  ;;  %v180_v28 = vsub.f32 %v178_v16, %v179_v23  ;;  %v1482_v40 = vpack.c.bf16 %v179_v23, %v172_v21 }
  0x40   :  { %1459 = vmatpush3.bf16.msra.mxu0 %v1458_v18  ;;  %v160_v29 = vand.u32 4294901760, %v159_v24  ;;  %v167_v30 = vand.u32 4294901760, %v166_v25  ;;  %v693_v49 = vand.u32 4294901760, %v1805_v45  ;;  %v700_v50 = vand.u32 4294901760, %v1807_v46 }
  0x41   :  { %v148_v31 = vsub.f32 %v146_v22, %v147_v27  ;;  %1460 = vmatprep.subr.bf16.mxu0 %v1699_v0  ;;  %v174_v33 = vand.u32 4294901760, %v173_v26  ;;  %v181_v34 = vand.u32 4294901760, %v180_v28  ;;  %v614_v51 = vand.u32 4294901760, %v590_v47 }
  0x42   :  { %v1461_v32 = vpack.c.bf16 %v167_v30, %v160_v29  ;;  %v617_v52 = vand.u32 4294901760, %v591_v48  ;;  %v694_v53 = vsub.f32 %v1805_v45, %v693_v49  ;;  %v701_v54 = vsub.f32 %v1807_v46, %v700_v50 }
  0x43   :  { %v149_v35 = vand.u32 4294901760, %v148_v31  ;;  %v1464_v36 = vpack.c.bf16 %v181_v34, %v174_v33  ;;  %v1817_v55 = vsub.f32 %v590_v47, %v614_v51  ;;  %v620_v63 = vand.u32 4294901760, %v592_v57 }
  0x44   :  { %v1819_v56 = vsub.f32 %v591_v48, %v617_v52  ;;  %v695_v59 = vand.u32 4294901760, %v694_v53  ;;  %v702_v60 = vand.u32 4294901760, %v701_v54  ;;  %v623_v2 = vand.u32 4294901760, %v593_v58 }
  0x45   :  { %1283 = vmatmul.mubr.f32.vlgmr.msra.gmra.mrb[0].mxu0 %v149_v35  ;;  %v707_v61 = vand.u32 4294901760, %v1817_v55  ;;  %v1825_v6 = vsub.f32 %v592_v57, %v620_v63  ;;  %v629_v13 = vand.u32 4294901760, %v595_v9  ;;  %v1843_v28 = vpack.c.bf16 %v611_v44, %v608_v43  ;;  %v1188_v43 = vld [vmem:[%s1935_s2] ss:$0 sm:$0xff] }
  0x46   :  { %1462 = vmatpush3.bf16.msra.mxu0 %v1461_v32  ;;  %1293 = vmatprep.mubr.msk.f32.mxu0 %vm1700_vm0, %v1701_v1  ;;  %v714_v62 = vand.u32 4294901760, %v1819_v56  ;;  %v1503_v3 = vpack.c.bf16 %v702_v60, %v695_v59  ;;  %v1827_v7 = vsub.f32 %v593_v58, %v623_v2  ;;  %v1848_v32 = vpack.c.bf16 %v617_v52, %v614_v51 }
  0x47   :  { %1463 = vmatprep.subr.bf16.mxu0 %v1699_v0  ;;  %v708_v4 = vsub.f32 %v1817_v55, %v707_v61  ;;  %v721_v14 = vand.u32 4294901760, %v1825_v6  ;;  %v1515_v33 = vpack.c.bf16 %v1807_v46, %v1805_v45  ;;  %v1855_v34 = vpack.c.bf16 %v623_v2, %v620_v63 }
  0x48   :  { %v715_v5 = vsub.f32 %v1819_v56, %v714_v62  ;;  %1504 = vmatpush3.bf16.msra.mxu1 %v1503_v3  ;;  %v728_v15 = vand.u32 4294901760, %v1827_v7  ;;  %v1518_v35 = vpack.c.bf16 %v1819_v56, %v1817_v55 }
  0x49   :  { %v709_v10 = vand.u32 4294901760, %v708_v4  ;;  %1505 = vmatprep.subr.bf16.mxu1 %v1699_v0  ;;  %v722_v19 = vsub.f32 %v1825_v6, %v721_v14 }
  0x4a   :  { %1465 = vmatpush3.bf16.msra.mxu0 %v1464_v36  ;;  %v716_v11 = vand.u32 4294901760, %v715_v5  ;;  %v729_v20 = vsub.f32 %v1827_v7, %v728_v15  ;;  %v1876_v41 = vpack.c.bf16 %v728_v15, %v721_v14 }
  0x4b   :  { %1466 = vmatprep.subr.bf16.mxu0 %v1699_v0  ;;  %v723_v23 = vand.u32 4294901760, %v722_v19 }
  0x4c   :  { %v1506_v16 = vpack.c.bf16 %v716_v11, %v709_v10  ;;  %v730_v24 = vand.u32 4294901760, %v729_v20 }
  0x4d   :  { %1294 = vmatmul.mubr.f32.vlgmr.msra.gmra.mrb[0].mxu0 %v145_v17 }
  0x4e   :  { %1468 = vmatpush3.bf16.msra.mxu0 %v1467_v37  ;;  %1304 = vmatprep.mubr.msk.f32.mxu0 %vm1700_vm0, %v1701_v1  ;;  %v1521_v37 = vpack.c.bf16 %v1827_v7, %v1825_v6 }
  0x4f   :  { %1469 = vmatprep.subr.bf16.mxu0 %v1699_v0  ;;  %1507 = vmatpush3.bf16.msra.mxu1 %v1506_v16 }
  0x50   :  { %1508 = vmatprep.subr.bf16.mxu1 %v1699_v0 }
  0x52   :  { %1471 = vmatpush3.bf16.msra.mxu0 %v1470_v38 }
  0x53   :  { %1472 = vmatprep.subr.bf16.mxu0 %v1699_v0 }
  0x55   :  { %1305 = vmatmul.mubr.f32.vlgmr.msra.gmra.mrb[0].mxu0 %v146_v22 }
  0x56   :  { %1474 = vmatpush3.bf16.msra.mxu0 %v1455_v12  ;;  %1315 = vmatprep.mubr.msk.f32.mxu0 %vm1700_vm0, %v1701_v1 }
  0x57   :  { %1475 = vmatprep.subr.bf16.mxu0 %v1699_v0 }
  0x5a   :  { %1477 = vmatpush3.bf16.msra.mxu0 %v1458_v18 }
  0x5b   :  { %1478 = vmatprep.subr.bf16.mxu0 %v1699_v0 }
  0x5d   :  { %1316 = vmatmul.mubr.f32.vlgmr.msra.gmra.mrb[0].mxu0 %v147_v27  ;;  %v1509_v27 = vpack.c.bf16 %v730_v24, %v723_v23 }
  0x5e   :  { %1480 = vmatpush3.bf16.msra.mxu0 %v1479_v39  ;;  %1326 = vmatprep.mubr.msk.f32.mxu0 %vm1700_vm0, %v1701_v1  ;;  %v1872_v39 = vpack.c.bf16 %v700_v50, %v693_v49 }
  0x5f   :  { %1481 = vmatprep.subr.bf16.mxu0 %v1699_v0  ;;  %1510 = vmatpush3.bf16.msra.mxu1 %v1509_v27 }
  0x60   :  { %1511 = vmatprep.subr.bf16.mxu1 %v1699_v0 }
  0x62   :  { %1483 = vmatpush3.bf16.msra.mxu0 %v1482_v40  ;;  %v1874_v40 = vpack.c.bf16 %v714_v62, %v707_v61 }
  0x63   :  { %1484 = vmatprep.subr.bf16.mxu0 %v1699_v0 }
  0x65   :  { %1327 = vmatmul.mubr.f32.vlgmr.msra.gmra.mrb[0].mxu0 %v145_v17 }
  0x66   :  { %1486 = vmatpush3.bf16.msra.mxu0 %v1455_v12  ;;  %1337 = vmatprep.mubr.msk.f32.mxu0 %vm1700_vm0, %v1701_v1  ;;  %v626_v12 = vand.u32 4294901760, %v594_v8 }
  0x67   :  { %1487 = vmatprep.subr.bf16.mxu0 %v1699_v0 }
  0x68   :  { %v1861_v36 = vpack.c.bf16 %v629_v13, %v626_v12 }
  0x6a   :  { %1489 = vmatpush3.bf16.msra.mxu0 %v1458_v18  ;;  %v1834_v18 = vsub.f32 %v595_v9, %v629_v13 }
  0x6b   :  { %1490 = vmatprep.subr.bf16.mxu0 %v1699_v0 }
  0x6c   :  { %v742_v22 = vand.u32 4294901760, %v1834_v18 }
  0x6d   :  { %1338 = vmatmul.mubr.f32.vlgmr.msra.gmra.mrb[0].mxu0 %v145_v17  ;;  %v1832_v17 = vsub.f32 %v594_v8, %v626_v12 }
  0x6e   :  { %1356 = vmatprep.mubr.msk.f32.mxu0 %vm1700_vm0, %v1701_v1  ;;  %v743_v26 = vsub.f32 %v1834_v18, %v742_v22  ;;  %1492 = vmatpush3.bf16.msra.mxu0 %v1843_v28 }
  0x6f   :  { %v735_v21 = vand.u32 4294901760, %v1832_v17  ;;  %1493 = vmatprep.subr.bf16.mxu0 %v1699_v0  ;;  %v1524_v38 = vpack.c.bf16 %v1834_v18, %v1832_v17  ;;  %v1189_v18 = vld [vmem:[%s1937_s4] ss:$0 sm:$0xff]  ;;  %s1702_s4 = smov [#allocation8]  }
  0x70   :  { %v744_v30 = vand.u32 4294901760, %v743_v26  ;;  %s1178_s6 = sshll.u32 %s1702_s4, 4  ;;  %s1179_s6 = int_to_ptr.vmem [resolvable:$true] %s1178_s6 }
  0x71   :  { %v736_v25 = vsub.f32 %v1832_v17, %v735_v21  ;;  %v1878_v42 = vpack.c.bf16 %v742_v22, %v735_v21  ;;  %s1666_s7 = scalar_lea.vmem %s1179_s6, 128  ;;  %p1671_p11 = scmp.lt.s32.totalorder %s1179_s6, %s1179_s6 }
  0x72   :  { %1495 = vmatpush3.bf16.msra.mxu0 %v1848_v32  ;;  %p1667_p10 = scmp.ne.s32.totalorder %s1179_s6, %s1666_s7  ;;  %p1672_p12 = scmp.lt.s32.totalorder %s1666_s7, %s1666_s7 }
  0x73   :  { %v737_v29 = vand.u32 4294901760, %v736_v25  ;;  %1496 = vmatprep.subr.bf16.mxu0 %v1699_v0 }
  0x74   :  { %p1673_p13 = por %p1672_p12, %p1671_p11 }
  0x75   :  { %v1512_v31 = vpack.c.bf16 %v744_v30, %v737_v29 }
  0x76   :  { %1498 = vmatpush3.bf16.msra.mxu0 %v1855_v34  ;;  %p1674_p0 = pnand %p1673_p13, %p1667_p10 }
  0x77   :  { %1513 = vmatpush3.bf16.msra.mxu1 %v1512_v31  ;;  %1499 = vmatprep.subr.bf16.mxu0 %v1699_v0 }
  0x78   :  { %1514 = vmatprep.subr.bf16.mxu1 %v1699_v0 }
  0x7a   :  { %1501 = vmatpush3.bf16.msra.mxu0 %v1861_v36 }
 0x140   :  { %v557_v44 = vpop.f32.mrb[0].mxu0 }
 0x141   :  { %v1562_v47 = vadd.f32 %v1188_v43, %v557_v44  ;;  %v1339_v48 = vpop.f32.mrb[1].mxu0 }
 0x143   :  { %v562_v51 = vmul.f32 0.70710677, %v1562_v47  ;;  %v561_v7 = vmul.f32 0.5, %v1562_v47 }
 0x145   :  { %v563_v52 = vand.u32 2147483647, %v562_v51  ;;  %vm583_vm2 = vcmp.lt.f32.partialorder %v562_v51, 0.0 }
 0x147   :  { %v564_v45 = vmul.f32 0.3275911, %v563_v52  ;;  %v577_v46 = vsub.f32 0.0, %v563_v52 }
 0x149   :  { %v565_v53 = vadd.f32 1.0, %v564_v45  ;;  %v578_v50 = vmul.f32 %v577_v46, %v563_v52 }
 0x14b   :  { %1592 = vrcp.f32 %v565_v53  ;;  %v579_v56 = vmul.f32 1.442695, %v578_v50 }
 0x14d   :  { %1594 = vpow2.f32 %v579_v56 }
 0x155   :  { %v1593_v49 = vpop.eup %1592 }
 0x156   :  { %v568_v54 = vmul.f32 1.0614054, %v1593_v49 }
 0x157   :  { %v1595_v2 = vpop.eup %1594 }
 0x158   :  { %v569_v55 = vadd.f32 -1.4531521, %v568_v54 }
 0x15a   :  { %v570_v57 = vmul.f32 %v1593_v49, %v569_v55 }
 0x15c   :  { %v571_v58 = vadd.f32 1.4214138, %v570_v57 }
 0x15e   :  { %v572_v59 = vmul.f32 %v1593_v49, %v571_v58 }
 0x160   :  { %v573_v60 = vadd.f32 -0.28449672, %v572_v59 }
 0x162   :  { %v574_v61 = vmul.f32 %v1593_v49, %v573_v60 }
 0x164   :  { %v575_v62 = vadd.f32 0.2548296, %v574_v61 }
 0x166   :  { %v576_v63 = vmul.f32 %v1593_v49, %v575_v62 }
 0x168   :  { %v581_v3 = vmul.f32 %v1595_v2, %v576_v63 }
 0x16a   :  { %v582_v4 = vsub.f32 1.0, %v581_v3 }
 0x16c   :  { %v584_v5 = vsub.f32 0.0, %v582_v4 }
 0x16e   :  { %v585_v6 = vsel %vm583_vm2, %v584_v5, %v582_v4 }
 0x16f   :  { %v586_v8 = vadd.f32 1.0, %v585_v6 }
 0x171   :  { %v587_v9 = vmul.f32 %v586_v8, %v561_v7 }
 0x173   :  { %v605_v10 = vsel %vm603_vm3, %v587_v9, 0 }
 0x174   :  { %v680_v11 = vand.u32 4294901760, %v605_v10 }
 0x176   :  { %v681_v12 = vsub.f32 %v605_v10, %v680_v11  ;;  %1376 = vmatmul.mubr.f32.vlgmr.msra.gmra.mrb[0].mxu1 %v680_v11 }
 0x177   :  { %1516 = vmatpush3.bf16.msra.mxu1 %v1515_v33  ;;  %1394 = vmatprep.mubr.msk.f32.mxu1 %vm1700_vm0, %v1701_v1 }
 0x178   :  { %1517 = vmatprep.subr.bf16.mxu1 %v1699_v0  ;;  %v682_v13 = vand.u32 4294901760, %v681_v12 }
 0x17a   :  { %v683_v14 = vsub.f32 %v681_v12, %v682_v13 }
 0x17b   :  { %1519 = vmatpush3.bf16.msra.mxu1 %v1518_v35 }
 0x17c   :  { %1520 = vmatprep.subr.bf16.mxu1 %v1699_v0  ;;  %v684_v15 = vand.u32 4294901760, %v683_v14 }
 0x17e   :  { %1357 = vmatmul.mubr.f32.vlgmr.msra.gmra.mrb[2].mxu0 %v684_v15 }
 0x17f   :  { %1522 = vmatpush3.bf16.msra.mxu1 %v1521_v37 }
 0x180   :  { %1523 = vmatprep.subr.bf16.mxu1 %v1699_v0 }
 0x183   :  { %1525 = vmatpush3.bf16.msra.mxu1 %v1524_v38 }
 0x184   :  { %1526 = vmatprep.subr.bf16.mxu1 %v1699_v0 }
 0x186   :  { %1395 = vmatmul.mubr.f32.vlgmr.msra.gmra.mrb[0].mxu1 %v681_v12 }
 0x187   :  { %1528 = vmatpush3.bf16.msra.mxu1 %v1843_v28  ;;  %1413 = vmatprep.mubr.msk.f32.mxu1 %vm1700_vm0, %v1701_v1 }
 0x188   :  { %1529 = vmatprep.subr.bf16.mxu1 %v1699_v0 }
 0x18b   :  { %1531 = vmatpush3.bf16.msra.mxu1 %v1848_v32 }
 0x18c   :  { %1532 = vmatprep.subr.bf16.mxu1 %v1699_v0 }
 0x18f   :  { %1534 = vmatpush3.bf16.msra.mxu1 %v1855_v34 }
 0x190   :  { %1535 = vmatprep.subr.bf16.mxu1 %v1699_v0 }
 0x193   :  { %1537 = vmatpush3.bf16.msra.mxu1 %v1861_v36 }
 0x194   :  { %1538 = vmatprep.subr.bf16.mxu1 %v1699_v0 }
 0x196   :  { %1414 = vmatmul.mubr.f32.vlgmr.msra.gmra.mrb[0].mxu1 %v682_v13 }
 0x197   :  { %1540 = vmatpush3.bf16.msra.mxu1 %v1872_v39  ;;  %1432 = vmatprep.mubr.msk.f32.mxu1 %vm1700_vm0, %v1701_v1 }
 0x198   :  { %1541 = vmatprep.subr.bf16.mxu1 %v1699_v0 }
 0x19b   :  { %1543 = vmatpush3.bf16.msra.mxu1 %v1874_v40 }
 0x19c   :  { %1544 = vmatprep.subr.bf16.mxu1 %v1699_v0 }
 0x19f   :  { %1546 = vmatpush3.bf16.msra.mxu1 %v1876_v41 }
 0x1a0   :  { %1547 = vmatprep.subr.bf16.mxu1 %v1699_v0 }
 0x1a3   :  { %1549 = vmatpush3.bf16.msra.mxu1 %v1878_v42 }
 0x1a4   :  { %1550 = vmatprep.subr.bf16.mxu1 %v1699_v0 }
 0x1a6   :  { %1433 = vmatmul.mubr.f32.vlgmr.msra.gmra.mrb[0].mxu1 %v680_v11 }
 0x1a7   :  { %1552 = vmatpush3.bf16.msra.mxu1 %v1843_v28  ;;  %1451 = vmatprep.mubr.msk.f32.mxu1 %vm1700_vm0, %v1701_v1 }
 0x1a8   :  { %1553 = vmatprep.subr.bf16.mxu1 %v1699_v0 }
 0x1ab   :  { %1555 = vmatpush3.bf16.msra.mxu1 %v1848_v32 }
 0x1ac   :  { %1556 = vmatprep.subr.bf16.mxu1 %v1699_v0 }
 0x1af   :  { %1558 = vmatpush3.bf16.msra.mxu1 %v1855_v34 }
 0x1b0   :  { %1559 = vmatprep.subr.bf16.mxu1 %v1699_v0 }
 0x1b3   :  { %1561 = vmatpush3.bf16.msra.mxu1 %v1861_v36 }
 0x1b6   :  { %1452 = vmatmul.mubr.f32.vlgmr.msra.gmra.mrb[0].mxu1 %v680_v11 }
 0x251   :  { %v686_v16 = vpop.f32.mrb[2].mxu0 }
 0x252   :  { %v1358_v17 = vpop.f32.mrb[3].mxu0  ;;  %v687_v1 = vadd.f32 %v1189_v18, %v686_v16 }
 0x289   :  { %v1140_v19 = vpop.f32.mrb[0].mxu1 }
 0x28a   :  { %v1564_v20 = vadd.f32 %v1140_v19, %v687_v1  ;;  %v1453_v21 = vpop.f32.mrb[1].mxu1 }
 0x28c   :  { %v1145_v22 = vmul.f32 0.70710677, %v1564_v20  ;;  %v1144_v43 = vmul.f32 0.5, %v1564_v20 }
 0x28e   :  { %v1146_v23 = vand.u32 2147483647, %v1145_v22  ;;  %vm1166_vm4 = vcmp.lt.f32.partialorder %v1145_v22, 0.0 }
 0x290   :  { %v1147_v24 = vmul.f32 0.3275911, %v1146_v23  ;;  %v1160_v26 = vsub.f32 0.0, %v1146_v23 }
 0x292   :  { %v1148_v25 = vadd.f32 1.0, %v1147_v24  ;;  %v1161_v27 = vmul.f32 %v1160_v26, %v1146_v23 }
 0x294   :  { %1596 = vrcp.f32 %v1148_v25  ;;  %v1162_v30 = vmul.f32 1.442695, %v1161_v27 }
 0x296   :  { %1598 = vpow2.f32 %v1162_v30 }
 0x29e   :  { %v1597_v0 = vpop.eup %1596 }
 0x29f   :  { %v1151_v28 = vmul.f32 1.0614054, %v1597_v0 }
 0x2a0   :  { %v1599_v38 = vpop.eup %1598 }
 0x2a1   :  { %v1152_v29 = vadd.f32 -1.4531521, %v1151_v28 }
 0x2a3   :  { %v1153_v31 = vmul.f32 %v1597_v0, %v1152_v29 }
 0x2a5   :  { %v1154_v32 = vadd.f32 1.4214138, %v1153_v31 }
 0x2a7   :  { %v1155_v33 = vmul.f32 %v1597_v0, %v1154_v32 }
 0x2a9   :  { %v1156_v34 = vadd.f32 -0.28449672, %v1155_v33 }
 0x2ab   :  { %v1157_v35 = vmul.f32 %v1597_v0, %v1156_v34 }
 0x2ad   :  { %v1158_v36 = vadd.f32 0.2548296, %v1157_v35 }
 0x2af   :  { %v1159_v37 = vmul.f32 %v1597_v0, %v1158_v36 }
 0x2b1   :  { %v1164_v39 = vmul.f32 %v1599_v38, %v1159_v37 }
 0x2b3   :  { %v1165_v40 = vsub.f32 1.0, %v1164_v39 }
 0x2b5   :  { %v1167_v41 = vsub.f32 0.0, %v1165_v40 }
 0x2b7   :  { %v1168_v42 = vsel %vm1166_vm4, %v1167_v41, %v1165_v40 }
 0x2b8   :  { %v1169_v44 = vadd.f32 1.0, %v1168_v42 }
 0x2ba   :  { %v1170_v47 = vmul.f32 %v1169_v44, %v1144_v43 }
 0x2bc   :  { %1171 = vst [vmem:[#allocation8] sm:$0xff] %v1170_v47 }
 0x2bd   :  { %1677 = shalt.err (!%p1674_p0)
}
 0x2be   :  { %s1678_s10 = scalar_lea.hbm %s1938_s5, 128 }
 0x2bf   :  { %p1679_p1 = scmp.ne.s32.totalorder %s1938_s5, %s1678_s10  ;;  %p1682_p2 = scmp.lt.u32.totalorder %s1678_s10, %s1938_s5 }
 0x2c1   :  { %p1684_p3 = pnand %p1682_p2, %p1679_p1 }
 0x2c3   :  { %1687 = shalt.err (!%p1684_p3)
}
 0x2c4   :  { %1181 = dma.vmem_to_hbm [thread:$0]  %s1179_s6, 128, %s1938_s5, [#allocation4]  }
 0x2c5   :  { %1692 = dma.done.wait [#allocation4], 128  }
 0x2c6   :  { %1693 = vsyncadd [#allocation4], 4294967168 }
 0x2c7   :  { %1185 = vsyncpa [#allocation3], 1 }
 0x2c8   :  { %1186 = vsyncpa [#allocation6], 1 }
 0x2c9   :  { %1187 = vsyncpa [#allocation4], 1 }

</bundles_post_ra>
